<compile_context>
chip_gen: v6e
topology: v6e:2x2x1
jax: 0.10.0
libtpu: 0.0.40
codegen_flags: <defaults>
</compile_context>

<pallas_src>
import jax
import jax.numpy as jnp
from jax.experimental import pallas as pl
from jax.experimental.pallas import tpu as pltpu

_MIB = 1024 * 1024
_LANE_CANDIDATES = (4096, 2048, 1024, 512, 256, 128)
# Never shrink a block below this: per-grid-step overhead (~0.35 us) must stay
# small vs. the block's DMA time, especially on single-TensorCore parts.
_MIN_BLOCK_BYTES = 512 * 1024

# Generation-aware tuning: (target_block_bytes, vmem_limit_bytes, tensorcores/chip).
#   v5e: 16 MiB scoped-VMEM default / 128 MiB physical, 1 TC
#   v6e: 32 MiB scoped default      / 128 MiB physical, 1 TC
#   v7x: 32 MiB scoped default      /  64 MiB physical, 2 TCs
_GEN_CONFIG = {
    "v5e": (2 * _MIB, 64 * _MIB, 1),
    "v6e": (4 * _MIB, 64 * _MIB, 1),
    "v7x": (4 * _MIB, 32 * _MIB, 2),
    "unknown": (2 * _MIB, None, 1),
}


def _tpu_generation() -> str:
    """Best-effort TPU generation detection (conservative fallback)."""
    try:
        kind = jax.devices()[0].device_kind.lower()
    except Exception:
        return "unknown"
    if "v6" in kind:
        return "v6e"
    if "v5e" in kind or "v5 lite" in kind or "v5lite" in kind:
        return "v5e"
    if "7" in kind:
        return "v7x"
    return "unknown"


def _copy_kernel(x_ref, o_ref):
    # Whole-tile, lane-dense copy of one (block_rows, lanes) slab.
    o_ref[...] = x_ref[...]


def _copy_plan(total: int, itemsize: int, target_block_bytes: int, n_tc: int):
    """Pick a lane-dense (rows, lanes) view and a sublane-aligned block size."""
    # Dtype-aware sublane multiple: (8,128) for f32, (16,128) bf16/f16,
    # (32,128) int8/fp8 native tiles.
    sub = max(8, 32 // max(1, itemsize))

    lanes = None
    for cand in _LANE_CANDIDATES:
        if total % cand == 0 and total // cand >= sub:
            lanes = cand
            break
    if lanes is None:
        for cand in _LANE_CANDIDATES:
            if total % cand == 0:
                lanes = cand
                break
    if lanes is None:
        return None  # element count not a multiple of 128

    rows = total // lanes
    row_bytes = lanes * itemsize

    # Start from the generation-tuned target block size ...
    block_rows = max(sub, target_block_bytes // row_bytes)

    # ... then, if the buffer is big enough, shrink so the grid has >= 4 steps
    # per TensorCore (hides prologue/epilogue DMAs; gives both v7x cores work),
    # but never below ~_MIN_BLOCK_BYTES per block (single-TC parts gain nothing
    # from tiny blocks, they only pay extra per-step overhead).
    min_steps = 4 * n_tc
    floor_rows = max(sub, (_MIN_BLOCK_BYTES // row_bytes // sub) * sub)
    if rows >= min_steps * sub:
        block_rows = min(block_rows, max(rows // min_steps, floor_rows))

    block_rows = min(block_rows, rows)
    if block_rows != rows:
        block_rows = max(sub, (block_rows // sub) * sub)
    return rows, lanes, block_rows


def _grouped_shape(x: jax.Array, g: int):
    if x.ndim == 4:
        b, c, h, w = x.shape
        if c % g:
            raise ValueError("channels must be divisible by groups")
        return (b, g, c // g, h, w)
    if x.ndim == 3:
        c, h, w = x.shape
        if c % g:
            raise ValueError("channels must be divisible by groups")
        return (g, c // g, h, w)
    raise ValueError(f"Unsupported input shape: {x.shape}")


def _materialized_copy(x: jax.Array, out_shape) -> jax.Array:
    """Roofline-bound, lane-dense Pallas copy into the grouped layout."""
    total = int(x.size)
    itemsize = jnp.dtype(x.dtype).itemsize

    gen = _tpu_generation()
    target_block_bytes, vmem_limit, n_tc = _GEN_CONFIG[gen]

    plan = _copy_plan(total, itemsize, target_block_bytes, n_tc)
    if plan is None:
        # TODO(synk): element count not a multiple of 128 -> no lane-dense
        # tiling; fall back to the exact, zero-copy metadata reshape.
        return jnp.reshape(x, out_shape)

    rows, lanes, block_rows = plan

    # Contiguous -> contiguous reshape: metadata-only, zero HBM traffic.
    x_flat = jnp.reshape(x, (rows, lanes))

    # NOTE: the input and output share this exact BlockSpec. The ragged final
    # block relies on OOB reads being padded and the *matching* OOB writes
    # being dropped; diverging block shapes / index maps would leak padding.
    spec = pl.BlockSpec((block_rows, lanes), lambda i: (i, 0))

    # On v7x the 1-D "parallel" grid should shard across both TensorCores;
    # if profiling shows one idle core, switch to pltpu.CORE_PARALLEL or an
    # explicit 2-wide leading grid axis.
    compiler_kwargs = dict(dimension_semantics=("parallel",))
    if vmem_limit is not None:
        compiler_kwargs["vmem_limit_bytes"] = vmem_limit

    out_flat = pl.pallas_call(
        _copy_kernel,
        out_shape=jax.ShapeDtypeStruct((rows, lanes), x.dtype),
        grid=(pl.cdiv(rows, block_rows),),
        in_specs=[spec],
        out_specs=spec,
        compiler_params=pltpu.CompilerParams(**compiler_kwargs),
        cost_estimate=pl.CostEstimate(
            flops=0,
            transcendentals=0,
            bytes_accessed=2 * total * itemsize,
        ),
    )(x_flat)

    # Free metadata reshape into the grouped layout.
    return jnp.reshape(out_flat, out_shape)


def grouper(x: jax.Array, g: int, *, materialize: bool = False) -> jax.Array:
    """Grouper.forward: (b,c,h,w)->(b,g,c//g,h,w) or (c,h,w)->(g,c//g,h,w).

    Default path (materialize=False): the contiguous channel-grouping is a
    pure metadata reshape (exactly the PyTorch view) -- zero HBM traffic,
    ~0 us on every TPU generation (performance-review recommendation #1).

    materialize=True: produce a distinct output buffer via the lane-dense
    Pallas copy kernel (only needed when downstream code requires a fresh
    buffer; an input_output_aliases={0: 0} + pltpu.touch variant could avoid
    even that copy if aliasing the input is acceptable).
    """
    out_shape = _grouped_shape(x, g)
    if not materialize:
        return jnp.reshape(x, out_shape)
    return _materialized_copy(x, out_shape)


if __name__ == "__main__":
    key = jax.random.PRNGKey(0)
    k0, k1, k2, k3, k4 = jax.random.split(key, 5)

    # ---- Default (zero-copy) path: module forward semantics. ----
    b, c, h, w = 2, 4, 16, 16
    g = 2
    x4 = jax.random.normal(k0, (b, c, h, w), dtype=jnp.float32)
    out4 = jax.block_until_ready(grouper(x4, g))
    ref4 = jnp.reshape(x4, (b, g, c // g, h, w))
    assert out4.shape == (b, g, c // g, h, w), out4.shape
    assert out4.dtype == x4.dtype, out4.dtype
    assert jnp.array_equal(out4, ref4), "4-D mismatch vs reference reshape"

    x3 = jax.random.normal(k1, (4, 16, 16), dtype=jnp.float32)
    out3 = jax.block_until_ready(grouper(x3, 2))
    assert jnp.array_equal(out3, jnp.reshape(x3, (2, 2, 16, 16))), "3-D mismatch"

    # Shape from the original PyTorch spec.
    x31 = jax.random.normal(k2, (1, 31, 64, 64), dtype=jnp.float32)
    out31 = jax.block_until_ready(grouper(x31, 31))
    ref31 = jnp.reshape(x31, (1, 31, 1, 64, 64))
    assert jnp.array_equal(out31, ref31), "31-channel mismatch"

    # ---- Materialized Pallas copy path. ----
    # Single lane-dense block (tiny buffer).
    outm4 = jax.block_until_ready(grouper(x4, g, materialize=True))
    assert jnp.array_equal(outm4, ref4), "materialized 4-D mismatch"

    # Spec shape: single (31, 4096) block.
    outm31 = jax.block_until_ready(grouper(x31, 31, materialize=True))
    assert jnp.array_equal(outm31, ref31), "materialized 31-channel mismatch"

    # Multi-step grid + dtype-aware (16,128) sublane rounding for bf16.
    xb = jax.random.normal(k3, (8, 32, 64, 64), dtype=jnp.bfloat16)
    outb = jax.block_until_ready(grouper(xb, 8, materialize=True))
    assert outb.dtype == jnp.bfloat16, outb.dtype
    assert jnp.array_equal(outb, jnp.reshape(xb, (8, 8, 4, 64, 64))), "bf16 mismatch"

    # Ragged final grid block (rows not a multiple of block_rows).
    xr = jax.random.normal(k4, (2, 44, 64, 64), dtype=jnp.float32)
    outr = jax.block_until_ready(grouper(xr, 4, materialize=True))
    assert jnp.array_equal(outr, jnp.reshape(xr, (2, 4, 11, 64, 64))), "ragged mismatch"

    print("KERNEL_OK")
</pallas_src>

<mosaic_0001>
module attributes {stable_mosaic.version = 11 : i64} {
  func.func @_copy_kernel(%arg0: i32, %arg1: memref<8x256xf32, #tpu.memory_space<vmem>>, %arg2: memref<8x256xf32, #tpu.memory_space<vmem>>) attributes {dimension_semantics = [#tpu.dimension_semantics<parallel>], iteration_bounds = array<i64: 1>, scalar_prefetch = 0 : i64, scratch_operands = 0 : i64, tpu.core_type = #tpu.core_type<tc>, window_params = [{transform_indices = @transform_0, window_bounds = array<i64: 8, 256>}, {transform_indices = @transform_1, window_bounds = array<i64: 8, 256>}]} {
    %c0 = arith.constant 0 : index
    %c0_0 = arith.constant 0 : index
    %0 = vector.load %arg1[%c0, %c0_0] : memref<8x256xf32, #tpu.memory_space<vmem>>, vector<8x256xf32>
    %c0_1 = arith.constant 0 : index
    %c0_2 = arith.constant 0 : index
    %1 = vector.load %arg2[%c0_1, %c0_2] : memref<8x256xf32, #tpu.memory_space<vmem>>, vector<8x256xf32>
    tpu.vector_store %arg2[%c0_1, %c0_2], %0 {strides = array<i32>} : memref<8x256xf32, #tpu.memory_space<vmem>>, vector<8x256xf32>,
    return
  }
  func.func @transform_0(%arg0: i32) -> (i32, i32) {
    %c0_i32 = arith.constant 0 : i32
    %c0_i32_0 = arith.constant 0 : i32
    return %arg0, %c0_i32 : i32, i32
  }
  func.func @transform_1(%arg0: i32) -> (i32, i32) {
    %c0_i32 = arith.constant 0 : i32
    %c0_i32_0 = arith.constant 0 : i32
    return %arg0, %c0_i32 : i32, i32
  }
}

</mosaic_0001>

<bundles_post_ra>
// kernel: tpu_custom_call.1
= control target key start
LH: loop header
LB: loop body
LE: loop exit
PB: predicated region body
PF: predicated region fallthrough
CT: control target
= control target key end

     0   :  { %6 = vsyncpa [#allocation3], 0  ;;  %s104_s0 = inlined_call_operand.hbm [shape: f32[8,256], index: 0, kind: input, shape index: {}]   ;;  %s105_s1 = inlined_call_operand.hbm [shape: f32[8,256], index: 1, kind: output, shape index: {}]  }
   0x1   :  { %7 = vsyncpa [#allocation4], 0  ;;  %s86_s6 = smov [#allocation2]  }
   0x2   :  { %s14_s7 = sshll.u32 %s86_s6, 4  ;;  %s15_s7 = int_to_ptr.vmem [resolvable:$true] %s14_s7 }
   0x3   :  { %s50_s8 = scalar_lea.vmem %s15_s7, 256  ;;  %p55_p1 = scmp.lt.s32.totalorder %s15_s7, %s15_s7 }
   0x4   :  { %p51_p0 = scmp.ne.s32.totalorder %s15_s7, %s50_s8  ;;  %p56_p2 = scmp.lt.s32.totalorder %s50_s8, %s50_s8 }
   0x6   :  { %p57_p3 = por %p56_p2, %p55_p1 }
   0x8   :  { %p58_p4 = pnand %p57_p3, %p51_p0 }
   0xa   :  { %61 = shalt.err (!%p58_p4)
}
   0xb   :  { %17 = dma.hbm_to_vmem [thread:$0]  %s104_s0, 256, %s15_s7, [#allocation3]  }
   0xc   :  { %82 = dma.done.wait [#allocation3], 256  }
   0xd   :  { %83 = vsyncadd [#allocation3], 4294967040  ;;  %s87_s11 = smov [#allocation5]   ;;  %v21_v0 = vld [vmem:[#allocation2] sm:$0xff]  ;;  %v22_v1 = vld [vmem:[#allocation2 + $0x8] sm:$0xff] }
   0xe   :  { %s31_s12 = sshll.u32 %s87_s11, 4  ;;  %23 = vst [vmem:[#allocation5] sm:$0xff] %v21_v0  ;;  %24 = vst [vmem:[#allocation5 + $0x8] sm:$0xff] %v22_v1  ;;  %s32_s12 = int_to_ptr.vmem [resolvable:$true] %s31_s12 }
   0xf   :  { %s62_s13 = scalar_lea.vmem %s32_s12, 256  ;;  %p67_p6 = scmp.lt.s32.totalorder %s32_s12, %s32_s12 }
  0x10   :  { %p63_p5 = scmp.ne.s32.totalorder %s32_s12, %s62_s13  ;;  %p68_p7 = scmp.lt.s32.totalorder %s62_s13, %s62_s13 }
  0x12   :  { %p69_p8 = por %p68_p7, %p67_p6 }
  0x14   :  { %p70_p9 = pnand %p69_p8, %p63_p5 }
  0x16   :  { %73 = shalt.err (!%p70_p9)
}
  0x17   :  { %34 = dma.vmem_to_hbm [thread:$0]  %s32_s12, 256, %s105_s1, [#allocation4]  }
  0x18   :  { %84 = dma.done.wait [#allocation4], 256  }
  0x19   :  { %85 = vsyncadd [#allocation4], 4294967040 }
  0x1a   :  { %38 = vsyncpa [#allocation3], 1 }
  0x1b   :  { %39 = vsyncpa [#allocation4], 1 }

</bundles_post_ra>
